<compile_context>
chip_gen: v5e
topology: v5e:2x2
jax: 0.10.0
libtpu: 0.0.40
codegen_flags: <defaults>
</compile_context>

<pallas_src>
import functools

import jax
import jax.numpy as jnp
from jax.experimental import pallas as pl
from jax.experimental.pallas import tpu as pltpu


def _make_dense_block_kernel(num_layers, c_in, growth, concat_input, mxu_dtype):
    """Build the fused kernel body (static layer loop, closed over shapes)."""

    def kernel(x_ref, *refs):
        scale_refs = refs[0:num_layers]
        shift_refs = refs[num_layers:2 * num_layers]
        w_refs = refs[2 * num_layers:3 * num_layers]
        o_ref = refs[3 * num_layers]
        acc_ref = refs[3 * num_layers + 1]        # VMEM [c_total, tile_n] f32

        x = x_ref[...]
        if x.dtype != jnp.float32:                # skip redundant cast for f32 input
            x = x.astype(jnp.float32)
        acc_ref[0:c_in, :] = x

        c = c_in
        for l in range(num_layers):
            # Folded BatchNorm + ReLU in f32 on the VPU.
            h = jnp.maximum(
                acc_ref[0:c, :] * scale_refs[l][...] + shift_refs[l][...], 0.0)
            # 1x1 conv == channel matmul on the MXU: [G, c] @ [c, tile_n]
            # -> output last dim is tile_n (lane dense).
            w = w_refs[l][...]
            if w.dtype != mxu_dtype:
                w = w.astype(mxu_dtype)
            out = jnp.dot(w, h.astype(mxu_dtype),
                          preferred_element_type=jnp.float32)
            acc_ref[c:c + growth, :] = out
            c += growth

        start = 0 if concat_input else c_in
        o_ref[...] = acc_ref[start:c, :].astype(o_ref.dtype)

    return kernel


def _auto_tile_n(n_spatial, c_in, c_out, c_total, param_bytes,
                 in_bytes, out_bytes, vmem_budget=24 * 1024 * 1024):
    """Pick a large lane tile that amortizes grid overhead yet fits VMEM."""
    lane_units = pl.cdiv(n_spatial, 128)
    # Large tiles (up to 1024) amortize per-step overhead; keep >= 2 grid
    # steps when the problem allows so the pipeline / megacore has overlap.
    units = min(8, max(1, lane_units // 2)) if lane_units > 1 else 1
    tile_n = 128 * units

    def vmem_estimate(t):
        return (2 * c_in * t * in_bytes        # x tile, double-buffered
                + 2 * c_out * t * out_bytes    # out tile, double-buffered
                + c_total * t * 4              # f32 accumulator scratch
                + 2 * param_bytes)             # per-layer scale/shift/weights

    while tile_n > 128 and vmem_estimate(tile_n) > vmem_budget:
        tile_n -= 128
    return tile_n


def dense_block_forward(x_nchw, params, *, concat_input=True, eps=1e-5,
                        use_bf16_matmul=False, tile_n=None):
    """Fused DenseBlock forward. Input/output are NCHW (PyTorch convention)."""
    B, C, H, W = x_nchw.shape
    num_layers = len(params)
    growth = params[0]["w"].shape[0]
    c_total = C + num_layers * growth
    c_out = c_total if concat_input else num_layers * growth

    # NCHW -> channel-first 2D [C, B*H*W]: spatial on the lane axis.
    n_spatial = B * H * W
    x2d = jnp.transpose(x_nchw, (1, 0, 2, 3)).reshape(C, n_spatial)

    # Fold BN into per-channel scale/shift once, outside the kernel.
    w_dtype = jnp.bfloat16 if use_bf16_matmul else jnp.float32
    scales, shifts, weights = [], [], []
    for p in params:
        scale = p["gamma"] * jax.lax.rsqrt(p["var"] + eps)
        shift = p["beta"] - p["mean"] * scale
        scales.append(scale.astype(jnp.float32).reshape(-1, 1))   # [C_l, 1]
        shifts.append(shift.astype(jnp.float32).reshape(-1, 1))   # [C_l, 1]
        weights.append(p["w"].astype(w_dtype))                    # [G, C_l]

    param_bytes = sum(s.size * 4 + sh.size * 4 + w.size * w.dtype.itemsize
                      for s, sh, w in zip(scales, shifts, weights))

    out_dtype = x_nchw.dtype
    out_bytes = jnp.dtype(out_dtype).itemsize
    if tile_n is None:
        tile_n = _auto_tile_n(n_spatial, C, c_out, c_total, param_bytes,
                              jnp.dtype(x_nchw.dtype).itemsize, out_bytes)
    assert tile_n % 128 == 0, "tile_n must be a multiple of 128"

    # Pad spatial axis to a multiple of tile_n (1x1 conv -> positions are
    # independent; padded columns are discarded afterwards).
    n_pad = pl.cdiv(n_spatial, tile_n) * tile_n
    if n_pad != n_spatial:
        x2d = jnp.pad(x2d, ((0, 0), (0, n_pad - n_spatial)))

    grid = (n_pad // tile_n,)
    in_specs = [pl.BlockSpec((C, tile_n), lambda i: (0, i))]
    for s in scales:
        in_specs.append(pl.BlockSpec(s.shape, lambda i: (0, 0)))
    for s in shifts:
        in_specs.append(pl.BlockSpec(s.shape, lambda i: (0, 0)))
    for w in weights:
        in_specs.append(pl.BlockSpec(w.shape, lambda i: (0, 0)))

    kernel = _make_dense_block_kernel(
        num_layers, C, growth, concat_input,
        jnp.bfloat16 if use_bf16_matmul else jnp.float32)

    # Explicit VMEM limit (conservative for v7x's 64 MiB physical VMEM).
    vmem_need = (2 * C * tile_n * 4 + 2 * c_out * tile_n * out_bytes
                 + c_total * tile_n * 4 + 2 * param_bytes)
    vmem_limit = int(min(64 * 1024 * 1024,
                         max(32 * 1024 * 1024, 2 * vmem_need)))

    y2d = pl.pallas_call(
        kernel,
        out_shape=jax.ShapeDtypeStruct((c_out, n_pad), out_dtype),
        grid_spec=pltpu.PrefetchScalarGridSpec(
            num_scalar_prefetch=0,
            grid=grid,
            in_specs=in_specs,
            out_specs=pl.BlockSpec((c_out, tile_n), lambda i: (0, i)),
            scratch_shapes=[pltpu.VMEM((c_total, tile_n), jnp.float32)],
        ),
        compiler_params=pltpu.CompilerParams(
            dimension_semantics=("parallel",),
            vmem_limit_bytes=vmem_limit,
        ),
    )(x2d, *scales, *shifts, *weights)

    y2d = y2d[:, :n_spatial]
    return jnp.transpose(y2d.reshape(c_out, B, H, W), (1, 0, 2, 3))


def init_dense_block_params(key, in_channels, growth_rate, num_layers):
    """Deterministic synthetic parameters matching DenseBlock's shapes."""
    params = []
    for i in range(num_layers):
        c_in = in_channels + i * growth_rate
        key, k1, k2, k3, k4, k5 = jax.random.split(key, 6)
        params.append(
            dict(
                gamma=1.0 + 0.1 * jax.random.normal(k1, (c_in,), jnp.float32),
                beta=0.1 * jax.random.normal(k2, (c_in,), jnp.float32),
                mean=0.1 * jax.random.normal(k3, (c_in,), jnp.float32),
                var=jnp.abs(jax.random.normal(k4, (c_in,), jnp.float32)) + 0.5,
                # Conv2d weight [G, C_in, 1, 1] -> store as [G, C_in]
                w=jax.random.normal(k5, (growth_rate, c_in), jnp.float32)
                / jnp.sqrt(c_in),
            )
        )
    return params


def dense_block_reference(x_nchw, params, *, concat_input=True, eps=1e-5):
    """Pure-jnp reference (no Pallas) for correctness checking."""
    B, C, H, W = x_nchw.shape
    x2d = jnp.transpose(x_nchw, (0, 2, 3, 1)).reshape(B * H * W, C)
    outs = [x2d] if concat_input else []
    layer_in = x2d
    for p in params:
        scale = p["gamma"] * jax.lax.rsqrt(p["var"] + eps)
        shift = p["beta"] - p["mean"] * scale
        h = jnp.maximum(layer_in * scale[None, :] + shift[None, :], 0.0)
        out = jnp.matmul(h, p["w"].T, precision=jax.lax.Precision.HIGHEST)
        outs.append(out)
        layer_in = jnp.concatenate([layer_in, out], axis=1)
    y2d = jnp.concatenate(outs, axis=1)
    c_out = y2d.shape[1]
    return jnp.transpose(y2d.reshape(B, H, W, c_out), (0, 3, 1, 2))


if __name__ == "__main__":
    B, C_IN, H, W = 2, 4, 16, 16
    GROWTH, NUM_LAYERS = 4, 3
    CONCAT_INPUT = True

    key = jax.random.PRNGKey(0)
    key, kx = jax.random.split(key)
    x = jax.random.normal(kx, (B, C_IN, H, W), jnp.float32)
    params = init_dense_block_params(key, C_IN, GROWTH, NUM_LAYERS)

    expected_c = NUM_LAYERS * GROWTH + (C_IN if CONCAT_INPUT else 0)
    y_ref = dense_block_reference(x, params, concat_input=CONCAT_INPUT)

    # Exact f32 path (matches PyTorch eval semantics).
    fwd_f32 = functools.partial(dense_block_forward,
                                concat_input=CONCAT_INPUT,
                                use_bf16_matmul=False)
    y = jax.block_until_ready(jax.jit(fwd_f32)(x, params))
    assert y.shape == (B, expected_c, H, W), y.shape
    assert jnp.allclose(y, y_ref, atol=1e-4, rtol=1e-4), float(
        jnp.max(jnp.abs(y - y_ref)))

    # bf16-MXU path (f32 elementwise + f32 accumulate), loose tolerance.
    fwd_bf16 = functools.partial(dense_block_forward,
                                 concat_input=CONCAT_INPUT,
                                 use_bf16_matmul=True)
    y_bf16 = jax.block_until_ready(jax.jit(fwd_bf16)(x, params))
    assert y_bf16.shape == (B, expected_c, H, W), y_bf16.shape
    assert jnp.allclose(y_bf16, y_ref, atol=0.25, rtol=0.05), float(
        jnp.max(jnp.abs(y_bf16 - y_ref)))

    print("KERNEL_OK")
</pallas_src>

<mosaic_0001>
module attributes {stable_mosaic.version = 11 : i64} {
  func.func @kernel(%arg0: i32, %arg1: memref<4x256xf32, #tpu.memory_space<vmem>>, %arg2: memref<4x1xf32, #tpu.memory_space<vmem>>, %arg3: memref<8x1xf32, #tpu.memory_space<vmem>>, %arg4: memref<12x1xf32, #tpu.memory_space<vmem>>, %arg5: memref<4x1xf32, #tpu.memory_space<vmem>>, %arg6: memref<8x1xf32, #tpu.memory_space<vmem>>, %arg7: memref<12x1xf32, #tpu.memory_space<vmem>>, %arg8: memref<4x4xf32, #tpu.memory_space<vmem>>, %arg9: memref<4x8xf32, #tpu.memory_space<vmem>>, %arg10: memref<4x12xf32, #tpu.memory_space<vmem>>, %arg11: memref<16x256xf32, #tpu.memory_space<vmem>>, %arg12: memref<16x256xf32, #tpu.memory_space<vmem>>) attributes {dimension_semantics = [#tpu.dimension_semantics<parallel>], iteration_bounds = array<i64: 2>, scalar_prefetch = 0 : i64, scratch_operands = 1 : i64, tpu.core_type = #tpu.core_type<tc>, window_params = [{transform_indices = @transform_0, window_bounds = array<i64: 4, 256>}, {pipeline_mode = #tpu.pipeline_mode<synchronous>, transform_indices = @transform_1, window_bounds = array<i64: 4, 1>}, {pipeline_mode = #tpu.pipeline_mode<synchronous>, transform_indices = @transform_2, window_bounds = array<i64: 8, 1>}, {pipeline_mode = #tpu.pipeline_mode<synchronous>, transform_indices = @transform_3, window_bounds = array<i64: 12, 1>}, {pipeline_mode = #tpu.pipeline_mode<synchronous>, transform_indices = @transform_4, window_bounds = array<i64: 4, 1>}, {pipeline_mode = #tpu.pipeline_mode<synchronous>, transform_indices = @transform_5, window_bounds = array<i64: 8, 1>}, {pipeline_mode = #tpu.pipeline_mode<synchronous>, transform_indices = @transform_6, window_bounds = array<i64: 12, 1>}, {pipeline_mode = #tpu.pipeline_mode<synchronous>, transform_indices = @transform_7, window_bounds = array<i64: 4, 4>}, {pipeline_mode = #tpu.pipeline_mode<synchronous>, transform_indices = @transform_8, window_bounds = array<i64: 4, 8>}, {pipeline_mode = #tpu.pipeline_mode<synchronous>, transform_indices = @transform_9, window_bounds = array<i64: 4, 12>}, {transform_indices = @transform_10, window_bounds = array<i64: 16, 256>}]} {
    %c0 = arith.constant 0 : index
    %c0_0 = arith.constant 0 : index
    %0 = vector.load %arg1[%c0, %c0_0] : memref<4x256xf32, #tpu.memory_space<vmem>>, vector<4x256xf32>
    %c0_1 = arith.constant 0 : index
    %c0_2 = arith.constant 0 : index
    %1 = vector.load %arg12[%c0_1, %c0_2] : memref<16x256xf32, #tpu.memory_space<vmem>>, vector<4x256xf32>
    tpu.vector_store %arg12[%c0_1, %c0_2], %0 {strides = array<i32>} : memref<16x256xf32, #tpu.memory_space<vmem>>, vector<4x256xf32>,
    %c0_3 = arith.constant 0 : index
    %c0_4 = arith.constant 0 : index
    %2 = vector.load %arg12[%c0_3, %c0_4] : memref<16x256xf32, #tpu.memory_space<vmem>>, vector<4x256xf32>
    %c0_5 = arith.constant 0 : index
    %c0_6 = arith.constant 0 : index
    %3 = vector.load %arg2[%c0_5, %c0_6] : memref<4x1xf32, #tpu.memory_space<vmem>>, vector<4x1xf32>
    %4 = vector.broadcast %3 : vector<4x1xf32> to vector<4x256xf32>
    %5 = arith.mulf %2, %4 : vector<4x256xf32>
    %c0_7 = arith.constant 0 : index
    %c0_8 = arith.constant 0 : index
    %6 = vector.load %arg5[%c0_7, %c0_8] : memref<4x1xf32, #tpu.memory_space<vmem>>, vector<4x1xf32>
    %7 = vector.broadcast %6 : vector<4x1xf32> to vector<4x256xf32>
    %8 = arith.addf %5, %7 : vector<4x256xf32>
    %cst = arith.constant 0.000000e+00 : f32
    %9 = vector.broadcast %cst : f32 to vector<4x256xf32>
    %10 = arith.maximumf %8, %9 : vector<4x256xf32>
    %c0_9 = arith.constant 0 : index
    %c0_10 = arith.constant 0 : index
    %11 = vector.load %arg8[%c0_9, %c0_10] : memref<4x4xf32, #tpu.memory_space<vmem>>, vector<4x4xf32>
    %cst_11 = arith.constant dense<0.000000e+00> : vector<4x256xf32>
    %12 = tpu.matmul %11, %10, %cst_11 {dimension_numbers = #tpu.dot_dimension_numbers<[1], [0], [0], [1], [0, 0, 1, 1], [], []>} : vector<4x4xf32>, vector<4x256xf32>, vector<4x256xf32> -> vector<4x256xf32>
    %c4 = arith.constant 4 : index
    %c0_12 = arith.constant 0 : index
    %13 = vector.load %arg12[%c4, %c0_12] : memref<16x256xf32, #tpu.memory_space<vmem>>, vector<4x256xf32>
    tpu.vector_store %arg12[%c4, %c0_12], %12 {strides = array<i32>} : memref<16x256xf32, #tpu.memory_space<vmem>>, vector<4x256xf32>,
    %c0_13 = arith.constant 0 : index
    %c0_14 = arith.constant 0 : index
    %14 = vector.load %arg12[%c0_13, %c0_14] : memref<16x256xf32, #tpu.memory_space<vmem>>, vector<8x256xf32>
    %c0_15 = arith.constant 0 : index
    %c0_16 = arith.constant 0 : index
    %15 = vector.load %arg3[%c0_15, %c0_16] : memref<8x1xf32, #tpu.memory_space<vmem>>, vector<8x1xf32>
    %16 = vector.broadcast %15 : vector<8x1xf32> to vector<8x256xf32>
    %17 = arith.mulf %14, %16 : vector<8x256xf32>
    %c0_17 = arith.constant 0 : index
    %c0_18 = arith.constant 0 : index
    %18 = vector.load %arg6[%c0_17, %c0_18] : memref<8x1xf32, #tpu.memory_space<vmem>>, vector<8x1xf32>
    %19 = vector.broadcast %18 : vector<8x1xf32> to vector<8x256xf32>
    %20 = arith.addf %17, %19 : vector<8x256xf32>
    %cst_19 = arith.constant 0.000000e+00 : f32
    %21 = vector.broadcast %cst_19 : f32 to vector<8x256xf32>
    %22 = arith.maximumf %20, %21 : vector<8x256xf32>
    %c0_20 = arith.constant 0 : index
    %c0_21 = arith.constant 0 : index
    %23 = vector.load %arg9[%c0_20, %c0_21] : memref<4x8xf32, #tpu.memory_space<vmem>>, vector<4x8xf32>
    %cst_22 = arith.constant dense<0.000000e+00> : vector<4x256xf32>
    %24 = tpu.matmul %23, %22, %cst_22 {dimension_numbers = #tpu.dot_dimension_numbers<[1], [0], [0], [1], [0, 0, 1, 1], [], []>} : vector<4x8xf32>, vector<8x256xf32>, vector<4x256xf32> -> vector<4x256xf32>
    %c8 = arith.constant 8 : index
    %c0_23 = arith.constant 0 : index
    %25 = vector.load %arg12[%c8, %c0_23] : memref<16x256xf32, #tpu.memory_space<vmem>>, vector<4x256xf32>
    tpu.vector_store %arg12[%c8, %c0_23], %24 {strides = array<i32>} : memref<16x256xf32, #tpu.memory_space<vmem>>, vector<4x256xf32>,
    %c0_24 = arith.constant 0 : index
    %c0_25 = arith.constant 0 : index
    %26 = vector.load %arg12[%c0_24, %c0_25] : memref<16x256xf32, #tpu.memory_space<vmem>>, vector<12x256xf32>
    %c0_26 = arith.constant 0 : index
    %c0_27 = arith.constant 0 : index
    %27 = vector.load %arg4[%c0_26, %c0_27] : memref<12x1xf32, #tpu.memory_space<vmem>>, vector<12x1xf32>
    %28 = vector.broadcast %27 : vector<12x1xf32> to vector<12x256xf32>
    %29 = arith.mulf %26, %28 : vector<12x256xf32>
    %c0_28 = arith.constant 0 : index
    %c0_29 = arith.constant 0 : index
    %30 = vector.load %arg7[%c0_28, %c0_29] : memref<12x1xf32, #tpu.memory_space<vmem>>, vector<12x1xf32>
    %31 = vector.broadcast %30 : vector<12x1xf32> to vector<12x256xf32>
    %32 = arith.addf %29, %31 : vector<12x256xf32>
    %cst_30 = arith.constant 0.000000e+00 : f32
    %33 = vector.broadcast %cst_30 : f32 to vector<12x256xf32>
    %34 = arith.maximumf %32, %33 : vector<12x256xf32>
    %c0_31 = arith.constant 0 : index
    %c0_32 = arith.constant 0 : index
    %35 = vector.load %arg10[%c0_31, %c0_32] : memref<4x12xf32, #tpu.memory_space<vmem>>, vector<4x12xf32>
    %cst_33 = arith.constant dense<0.000000e+00> : vector<4x256xf32>
    %36 = tpu.matmul %35, %34, %cst_33 {dimension_numbers = #tpu.dot_dimension_numbers<[1], [0], [0], [1], [0, 0, 1, 1], [], []>} : vector<4x12xf32>, vector<12x256xf32>, vector<4x256xf32> -> vector<4x256xf32>
    %c12 = arith.constant 12 : index
    %c0_34 = arith.constant 0 : index
    %37 = vector.load %arg12[%c12, %c0_34] : memref<16x256xf32, #tpu.memory_space<vmem>>, vector<4x256xf32>
    tpu.vector_store %arg12[%c12, %c0_34], %36 {strides = array<i32>} : memref<16x256xf32, #tpu.memory_space<vmem>>, vector<4x256xf32>,
    %c0_35 = arith.constant 0 : index
    %c0_36 = arith.constant 0 : index
    %38 = vector.load %arg12[%c0_35, %c0_36] : memref<16x256xf32, #tpu.memory_space<vmem>>, vector<16x256xf32>
    %c0_37 = arith.constant 0 : index
    %c0_38 = arith.constant 0 : index
    %39 = vector.load %arg11[%c0_37, %c0_38] : memref<16x256xf32, #tpu.memory_space<vmem>>, vector<16x256xf32>
    tpu.vector_store %arg11[%c0_37, %c0_38], %38 {strides = array<i32>} : memref<16x256xf32, #tpu.memory_space<vmem>>, vector<16x256xf32>,
    return
  }
  func.func @transform_0(%arg0: i32) -> (i32, i32) {
    %c0_i32 = arith.constant 0 : i32
    %c0_i32_0 = arith.constant 0 : i32
    return %c0_i32, %arg0 : i32, i32
  }
  func.func @transform_1(%arg0: i32) -> (i32, i32) {
    %c0_i32 = arith.constant 0 : i32
    %c0_i32_0 = arith.constant 0 : i32
    %c0_i32_1 = arith.constant 0 : i32
    return %c0_i32, %c0_i32_0 : i32, i32
  }
  func.func @transform_2(%arg0: i32) -> (i32, i32) {
    %c0_i32 = arith.constant 0 : i32
    %c0_i32_0 = arith.constant 0 : i32
    %c0_i32_1 = arith.constant 0 : i32
    return %c0_i32, %c0_i32_0 : i32, i32
  }
  func.func @transform_3(%arg0: i32) -> (i32, i32) {
    %c0_i32 = arith.constant 0 : i32
    %c0_i32_0 = arith.constant 0 : i32
    %c0_i32_1 = arith.constant 0 : i32
    return %c0_i32, %c0_i32_0 : i32, i32
  }
  func.func @transform_4(%arg0: i32) -> (i32, i32) {
    %c0_i32 = arith.constant 0 : i32
    %c0_i32_0 = arith.constant 0 : i32
    %c0_i32_1 = arith.constant 0 : i32
    return %c0_i32, %c0_i32_0 : i32, i32
  }
  func.func @transform_5(%arg0: i32) -> (i32, i32) {
    %c0_i32 = arith.constant 0 : i32
    %c0_i32_0 = arith.constant 0 : i32
    %c0_i32_1 = arith.constant 0 : i32
    return %c0_i32, %c0_i32_0 : i32, i32
  }
  func.func @transform_6(%arg0: i32) -> (i32, i32) {
    %c0_i32 = arith.constant 0 : i32
    %c0_i32_0 = arith.constant 0 : i32
    %c0_i32_1 = arith.constant 0 : i32
    return %c0_i32, %c0_i32_0 : i32, i32
  }
  func.func @transform_7(%arg0: i32) -> (i32, i32) {
    %c0_i32 = arith.constant 0 : i32
    %c0_i32_0 = arith.constant 0 : i32
    %c0_i32_1 = arith.constant 0 : i32
    return %c0_i32, %c0_i32_0 : i32, i32
  }
  func.func @transform_8(%arg0: i32) -> (i32, i32) {
    %c0_i32 = arith.constant 0 : i32
    %c0_i32_0 = arith.constant 0 : i32
    %c0_i32_1 = arith.constant 0 : i32
    return %c0_i32, %c0_i32_0 : i32, i32
  }
  func.func @transform_9(%arg0: i32) -> (i32, i32) {
    %c0_i32 = arith.constant 0 : i32
    %c0_i32_0 = arith.constant 0 : i32
    %c0_i32_1 = arith.constant 0 : i32
    return %c0_i32, %c0_i32_0 : i32, i32
  }
  func.func @transform_10(%arg0: i32) -> (i32, i32) {
    %c0_i32 = arith.constant 0 : i32
    %c0_i32_0 = arith.constant 0 : i32
    return %c0_i32, %arg0 : i32, i32
  }
}

</mosaic_0001>

<bundles_post_ra>
// kernel: dense_block_forward.1
= control target key start
LH: loop header
LB: loop body
LE: loop exit
PB: predicated region body
PF: predicated region fallthrough
CT: control target
= control target key end

     0   :  { %s835_s13 = smov 0   ;;  %s837_s14 = smov 0   ;;  %s932_s0 = inlined_call_operand.vmem [shape: f32[4,512], index: 0, kind: input, shape index: {}]   ;;  %s933_s1 = inlined_call_operand.vmem [shape: f32[4,1], index: 1, kind: input, shape index: {}]   ;;  %s934_s2 = inlined_call_operand.vmem [shape: f32[8,1], index: 2, kind: input, shape index: {}]   ;;  %s935_s3 = inlined_call_operand.vmem [shape: f32[12,1], index: 3, kind: input, shape index: {}]   ;;  %s936_s4 = inlined_call_operand.vmem [shape: f32[4,1], index: 4, kind: input, shape index: {}]   ;;  %s937_s5 = inlined_call_operand.vmem [shape: f32[8,1], index: 5, kind: input, shape index: {}]   ;;  %s938_s6 = inlined_call_operand.vmem [shape: f32[12,1], index: 6, kind: input, shape index: {}]   ;;  %s939_s7 = inlined_call_operand.vmem [shape: f32[4,4], index: 7, kind: input, shape index: {}]   ;;  %s940_s8 = inlined_call_operand.vmem [shape: f32[4,8], index: 8, kind: input, shape index: {}]   ;;  %s941_s9 = inlined_call_operand.vmem [shape: f32[4,12], index: 9, kind: input, shape index: {}]   ;;  %s942_s10 = inlined_call_operand.vmem [shape: f32[16,512], index: 10, kind: output, shape index: {}]  }
   0x1   :  { %s839_s15 = smov 0  }
   0x2 LB: > { %s848_s16 = sadd.s32 4294967295, %s777_s15   ;;  %s850_s17 = sadd.s32 1, %s777_s15   ;;  %s777_s15 = sphi %s839_s15, %s946_s15   ;;  %s773_s14 = sphi %s837_s14, %s945_s14   ;;  %s769_s13 = sphi %s835_s13, %s944_s13  }
   0x3   : > { %s239_s18 = ssub.s32 %s777_s15, %s850_s17  ;;  %s242_s19 = sadd.s32 1, %s773_s14 }
   0x4   : > { %p240_p0 = scmp.eq.s32.totalorder %s239_s18, 0  ;;  %p252_p1 = scmp.ne.s32.totalorder %s773_s14, %s769_s13 }
   0x5   : > { %p253_p2 = scmp.eq.s32.totalorder %s848_s16, 1  ;;  %p707_p3 = scmp.ge.s32.totalorder %s777_s15, 1 }
   0x6   : > { %s858_s20 = scalar_select %p240_p0, %s773_s14, %s242_s19  }
   0x7   : > { %p860_p4 = por %p253_p2, %p252_p1  ;;  %p313_p5 = scmp.lt.s32.totalorder %s777_s15, 3 }
   0x9   : > { %p314_p6 = pnand %p707_p3, %p313_p5 }
   0xa   : > { %s709_s28 = sshll.u32 (!%p314_p6), %s848_s16, 1  ;;  %s347_s11 = sand.u32 (!%p314_p6), 1, %s769_s13  }
   0xb   : > { %317 = sbr.rel (%p314_p6) target bundleno = 584 (0x248), region = 60  ;;  %p351_p7 = scmp.lt.s32.totalorder (!%p314_p6), %s709_s28, 3 }
  0x10   : > { %v368_v0 = vld [vmem:[%s933_s1] sm:$0xf]  ;;  %v779_v1 = vmov 0   ;;  %v534_v3 = vld [vmem:[%s938_s6 + $0x8] sm:$0xf]  ;;  %s948_s28 = smov (!%p351_p7, %s709_s28), 3 }
  0x11   : > { %752 = vset.pattern.permute.xlu0 %v779_v1  ;;  %753 = vset.pattern.permute.xlu1 %v779_v1  ;;  %v376_v2 = vld [vmem:[%s936_s4] sm:$0xf]  ;;  %s710_s29 = sshll.u32 %s948_s28, 2  ;;  %v518_v9 = vld [vmem:[%s935_s3 + $0x8] sm:$0xf]  ;;  %vm391_vm0 = vcmask 1043456  }
  0x12   : > { %371 = vperm.xlu0 %752, %v368_v0   ;;  %754 = vset.pattern.permute.xlu2 %v779_v1  ;;  %s354_s12 = scalar_lea.vmem %s932_s0, %s710_s29  ;;  %v448_v7 = vld [vmem:[%s934_s2] sm:$0xff]  ;;  %vm387_vm1 = vcmask 31744   ;;  %vm467_vm2 = vcmask 64512   ;;  %vm554_vm3 = vcmask 97280   ;;  %s726_s23 = sshll.u32 (%p860_p4), %s848_s16, 4 }
  0x13   : > { %v357_v4 = vld [vmem:[%s354_s12] sm:$0xff]  ;;  %451 = vperm.xlu1 %753, %v448_v7   ;;  %526 = vperm.xlu2 %754, %v518_v9   ;;  %s708_s12 = sshll.u32 %s347_s11, 5  ;;  %s629_s26 = scalar_lea.vmem (%p860_p4), %s942_s10, %s726_s23 }
  0x14   : > { %359 = vst [vmem:[#allocation1] ss:$2 sm:$0xff] %v357_v4  ;;  %v456_v8 = vld [vmem:[%s937_s5] sm:$0xff]  ;;  %s898_s15 = scalar_lea.vmem [#allocation3], %s708_s12 }
  0x15   : > { %v517_v10 = vld [vmem:[%s935_s3] sm:$0xff] }
  0x16   : > { %v533_v11 = vld [vmem:[%s938_s6] sm:$0xff] }
  0x17   : > { %v386_v22 = vld [vmem:[%s939_s7] sm:$0xf] }
  0x18   : > { %v466_v36 = vld [vmem:[%s940_s8] sm:$0xf] }
  0x19   : > { %v553_v57 = vld [vmem:[%s941_s9] sm:$0xf] }
  0x1a   : > { %379 = vperm.xlu0 %752, %v376_v2  }
  0x1b   : > { %v360_v5 = vld.sshfl [vmem:[#allocation1] sm:$0xff pattern:$0x75316420]  ;;  %v361_v6 = vld.sshfl [vmem:[#allocation1 + $0x8] sm:$0xff pattern:$0x75316420]  ;;  %459 = vperm.xlu1 %753, %v456_v8   ;;  %521 = vperm.xlu2 %754, %v517_v10  }
  0x1c   : > { %364 = vst [vmem:[#allocation2 + $0x10] sm:$0xf] %v360_v5 }
  0x1d   : > { %365 = vst [vmem:[#allocation2] sm:$0xf] %v361_v6 }
  0x22   : > { %542 = vperm.xlu0 %752, %v534_v3  }
  0x23   : > { %537 = vperm.xlu1 %753, %v533_v11   ;;  %v366_v13 = vld [vmem:[#allocation2 + $0x10] sm:$0xf] }
  0x24   : > { %v367_v14 = vld [vmem:[#allocation2] sm:$0xf] }
  0x6d   : > { %v527_v38 = vpop.permute.xlu2 %526 }
  0x75   : > { %v522_v41 = vpop.permute.xlu2 %521 }
  0x84   : > { %v372_v12 = vpop.permute.xlu0 %371 }
  0x85   : > { %v374_v15 = vmul.f32 %v372_v12, %v366_v13  ;;  %v375_v16 = vmul.f32 %v372_v12, %v367_v14  ;;  %v452_v27 = vpop.permute.xlu1 %451 }
  0x8c   : > { %v380_v17 = vpop.permute.xlu0 %379 }
  0x8d   : > { %v382_v18 = vadd.f32 %v380_v17, %v374_v15  ;;  %v383_v19 = vadd.f32 %v380_v17, %v375_v16  ;;  %v460_v31 = vpop.permute.xlu1 %459 }
  0x8f   : > { %v384_v20 = vmax.f32 %v382_v18, 0.0  ;;  %v385_v21 = vmax.f32 %v383_v19, 0.0 }
  0x91   : > { %711 = vmatpush.msk.msra.mxu0 %vm391_vm0, %v384_v20  ;;  %713 = vmatpush.msk.msra.mxu1 %vm391_vm0, %v385_v21 }
  0x92   : > { %712 = vmatmul.msk.f32.vlgmr.msra.gmra.mxu0 %vm387_vm1, %v386_v22  ;;  %714 = vmatmul.msk.f32.vlgmr.msra.gmra.mxu1 %vm387_vm1, %v386_v22 }
  0x94   : > { %v543_v47 = vpop.permute.xlu0 %542 }
  0x95   : > { %v538_v48 = vpop.permute.xlu1 %537 }
 0x10f   : > { %v415_v23 = vpop.f32.mrf.mxu0  ;;  %v435_v24 = vpop.f32.mrf.mxu1 }
 0x110   : > { %v440_v25 = vrot.slane %v415_v23, 4  ;;  %v441_v26 = vrot.slane %v435_v24, 4 }
 0x112   : > { %444 = vst [vmem:[#allocation2 + $0x10] sm:$0xf0] %v440_v25 }
 0x113   : > { %445 = vst [vmem:[#allocation2] sm:$0xf0] %v441_v26 }
 0x119   : > { %v612_v28 = vld [vmem:[#allocation2 + $0x10] sm:$0xff] }
 0x11a   : > { %616 = vst [vmem:[%s898_s15] sm:$0xff] %v612_v28  ;;  %v613_v29 = vld [vmem:[#allocation2] sm:$0xff]  ;;  %v454_v30 = vmul.f32 %v612_v28, %v452_v27  ;;  %v529_v42 = vmul.f32 %v612_v28, %v522_v41 }
 0x11b   : > { %617 = vst [vmem:[%s898_s15 + $0x8] sm:$0xff] %v613_v29  ;;  %v455_v32 = vmul.f32 %v613_v29, %v452_v27  ;;  %v530_v43 = vmul.f32 %v613_v29, %v522_v41 }
 0x11c   : > { %v462_v33 = vadd.f32 %v460_v31, %v454_v30  ;;  %v545_v51 = vadd.f32 %v538_v48, %v529_v42 }
 0x11d   : > { %v463_v34 = vadd.f32 %v460_v31, %v455_v32  ;;  %v546_v53 = vadd.f32 %v538_v48, %v530_v43 }
 0x11e   : > { %v464_v35 = vmax.f32 %v462_v33, 0.0  ;;  %v549_v56 = vmax.f32 %v545_v51, 0.0 }
 0x11f   : > { %v465_v37 = vmax.f32 %v463_v34, 0.0  ;;  %v550_v58 = vmax.f32 %v546_v53, 0.0 }
 0x120   : > { %486 = vmatpush.msra.mxu2 %v464_v35 }
 0x121   : > { %506 = vmatpush.msra.mxu3 %v465_v37  ;;  %715 = vmatmul.msk.f32.vlgmr.msra.gmra.mxu2 %vm467_vm2, %v466_v36  ;;  %v642_v1 = vld [vmem:[%s898_s15] sm:$0xff] (%p860_p4) }
 0x122   : > { %716 = vmatmul.msk.f32.vlgmr.msra.gmra.mxu3 %vm467_vm2, %v466_v36  ;;  %v644_v2 = vld [vmem:[%s898_s15 + $0x8] sm:$0xff] (%p860_p4)  ;;  %643 = vst [vmem:[%s629_s26] sm:$0xff] (%p860_p4), %v642_v1 }
 0x123   : > { %645 = vst [vmem:[%s629_s26 + $0x8] sm:$0xff] (%p860_p4), %v644_v2 }
 0x1a4   : > { %v488_v39 = vpop.f32.mrf.mxu2 }
 0x1a5   : > { %511 = vst [vmem:[#allocation2 + $0x18] sm:$0xf] %v488_v39  ;;  %v508_v40 = vpop.f32.mrf.mxu3 }
 0x1a6   : > { %512 = vst [vmem:[#allocation2 + $0x8] sm:$0xf] %v508_v40 }
 0x1ac   : > { %v515_v44 = vld [vmem:[#allocation2 + $0x18] sm:$0xf] }
 0x1ad   : > { %v531_v45 = vmul.f32 %v527_v38, %v515_v44  ;;  %v516_v46 = vld [vmem:[#allocation2 + $0x8] sm:$0xf] }
 0x1ae   : > { %v532_v49 = vmul.f32 %v527_v38, %v516_v46 }
 0x1af   : > { %v547_v50 = vadd.f32 %v543_v47, %v531_v45 }
 0x1b0   : > { %v548_v52 = vadd.f32 %v543_v47, %v532_v49 }
 0x1b1   : > { %v551_v54 = vmax.f32 %v547_v50, 0.0 }
 0x1b2   : > { %v552_v55 = vmax.f32 %v548_v52, 0.0 }
 0x1b3   : > { %717 = vmatpush.msk.msrb.mxu0 %vm391_vm0, %v551_v54 }
 0x1b4   : > { %719 = vmatpush.msk.msrb.mxu1 %vm391_vm0, %v552_v55 }
 0x1b5   : > { %579 = vmatpush.msrb.mxu0 %v549_v56 }
 0x1b6   : > { %599 = vmatpush.msrb.mxu1 %v550_v58  ;;  %718 = vmatmul.msk.f32.vlgmr.msrb.gmra.mxu0 %vm554_vm3, %v553_v57 }
 0x1b7   : > { %720 = vmatmul.msk.f32.vlgmr.msrb.gmra.mxu1 %vm554_vm3, %v553_v57 }
 0x233   : > { %v581_v59 = vpop.f32.mrf.mxu0 }
 0x234   : > { %v606_v60 = vrot.slane %v581_v59, 4  ;;  %v601_v61 = vpop.f32.mrf.mxu1 }
 0x235   : > { %v607_v62 = vrot.slane %v601_v61, 4 }
 0x236   : > { %610 = vst [vmem:[#allocation2 + $0x18] sm:$0xf0] %v606_v60 }
 0x237   : > { %611 = vst [vmem:[#allocation2 + $0x8] sm:$0xf0] %v607_v62 }
 0x23b   : > { %626 = sbr.rel (!%p860_p4) target bundleno = 584 (0x248), region = 64 }
 0x23d   : > { %v614_v63 = vld [vmem:[#allocation2 + $0x18] sm:$0xff] }
 0x23e   : > { %618 = vst [vmem:[%s898_s15 + $0x10] sm:$0xff] %v614_v63  ;;  %v615_v0 = vld [vmem:[#allocation2 + $0x8] sm:$0xff] }
 0x23f   : > { %619 = vst [vmem:[%s898_s15 + $0x18] sm:$0xff] %v615_v0 }
 0x245   : > { %v646_v3 = vld [vmem:[%s898_s15 + $0x10] sm:$0xff] }
 0x246   : > { %v648_v4 = vld [vmem:[%s898_s15 + $0x18] sm:$0xff]  ;;  %647 = vst [vmem:[%s629_s26 + $0x20] sm:$0xff] %v646_v3 }
 0x247   : > { %649 = vst [vmem:[%s629_s26 + $0x28] sm:$0xff] %v648_v4 }
 0x248 PF: > { %p17_p8 = scmp.ge.s32.totalorder %s850_s17, 4   ;;  %s944_s13 = smov %s773_s14 }
 0x249   : > { %s945_s14 = smov %s858_s20  ;;  %s946_s15 = smov %s850_s17 }
 0x24a   :  { %19 = sbr.rel (!%p17_p8) target bundleno = 2 (0x2), region = 113 }

</bundles_post_ra>
